<compile_context>
chip_gen: v5e
topology: v5e:2x2
jax: 0.10.0
libtpu: 0.0.40
codegen_flags: <defaults>
</compile_context>

<pallas_src>
import math

import jax
import jax.numpy as jnp
from jax.experimental import pallas as pl
from jax.experimental.pallas import tpu as pltpu

_VMEM_LIMIT = 32 * 1024 * 1024  # conservative scoped-VMEM budget, safe on v5e/v6e/v7x


# ------------------------- tiled fused linear (matmul + bias) -------------------------

def _linear_kernel(x_ref, w_ref, b_ref, o_ref, acc_ref):
    k = pl.program_id(2)

    @pl.when(k == 0)
    def _():
        # fold the bias into the accumulator init (saves an epilogue add)
        acc_ref[...] = jnp.broadcast_to(b_ref[...].astype(jnp.float32), acc_ref.shape)

    acc_ref[...] += jnp.dot(x_ref[...], w_ref[...], preferred_element_type=jnp.float32)

    @pl.when(k == pl.num_programs(2) - 1)
    def _():
        o_ref[...] = acc_ref[...].astype(o_ref.dtype)


def pallas_linear(x2d, w, b, *, tm=256, tn=256, tk=512):
    """y = x2d @ w + b.  x2d: [N, Din], w: [Din, Dout], b: [Dout].

    Tiled over rows (tm), output columns (tn) and the contraction axis (tk); the K axis
    is the innermost ("arbitrary") grid axis accumulating into a VMEM f32 scratch."""
    N, Din = x2d.shape
    Dout = w.shape[1]
    bm = N if N <= tm else tm        # tm multiple of 8
    bn = Dout if Dout <= tn else tn  # tn multiple of 128
    # Only tile K when it divides evenly: padded partial K-blocks would feed garbage
    # into the accumulator.  Partial M/N blocks are safe (out-of-bounds writes dropped).
    bk = Din if (Din <= tk or Din % tk != 0) else tk
    grid = (pl.cdiv(N, bm), pl.cdiv(Dout, bn), pl.cdiv(Din, bk))
    return pl.pallas_call(
        _linear_kernel,
        out_shape=jax.ShapeDtypeStruct((N, Dout), x2d.dtype),
        grid=grid,
        in_specs=[
            pl.BlockSpec((bm, bk), lambda i, j, k: (i, k)),
            pl.BlockSpec((bk, bn), lambda i, j, k: (k, j)),
            pl.BlockSpec((1, bn), lambda i, j, k: (0, j)),
        ],
        out_specs=pl.BlockSpec((bm, bn), lambda i, j, k: (i, j)),
        scratch_shapes=[pltpu.VMEM((bm, bn), jnp.float32)],
        compiler_params=pltpu.CompilerParams(
            dimension_semantics=("parallel", "parallel", "arbitrary"),
            vmem_limit_bytes=_VMEM_LIMIT,
        ),
    )(x2d, w, b.reshape(1, Dout))


# -------------------- time-delay aggregation (scalar-prefetched shifts) --------------------

def _time_delay_agg_kernel(idx_ref, w_ref, v_ref, o_ref, v2_ref):
    # idx_ref: SMEM [k] int32 delays, w_ref: SMEM [B, k] f32 softmax weights
    # v_ref:   VMEM (L, tc)            o_ref: VMEM (L, tc)
    # v2_ref:  VMEM scratch (2L, tc) -- V duplicated along time so a shift is a
    #          static-size dynamic-start sublane slice (no HBM duplication needed).
    b = pl.program_id(0)
    L = o_ref.shape[0]
    v = v_ref[...]
    v2_ref[pl.ds(0, L), :] = v
    v2_ref[pl.ds(L, L), :] = v
    acc = jnp.zeros(o_ref.shape, jnp.float32)
    for i in range(idx_ref.shape[0]):  # k ~ log(L): tiny static unrolled loop
        d = idx_ref[i]
        acc = acc + w_ref[b, i] * v2_ref[pl.ds(d, L), :].astype(jnp.float32)
    o_ref[...] = acc.astype(o_ref.dtype)


def pallas_time_delay_agg(v_blc, index, weights):
    """out[b, l, c] = sum_i weights[b, i] * v_blc[b, (l + index[i]) % L, c].

    v_blc: [B, L, C] (channel axis lane-dense), index: [k] int32, weights: [B, k] f32."""
    B, L, C = v_blc.shape
    tc = C if C <= 512 else 512
    grid = (B, pl.cdiv(C, tc))
    return pl.pallas_call(
        _time_delay_agg_kernel,
        out_shape=jax.ShapeDtypeStruct((B, L, C), v_blc.dtype),
        grid_spec=pltpu.PrefetchScalarGridSpec(
            num_scalar_prefetch=2,
            grid=grid,
            in_specs=[pl.BlockSpec((None, L, tc), lambda b, c, idx, w: (b, 0, c))],
            out_specs=pl.BlockSpec((None, L, tc), lambda b, c, idx, w: (b, 0, c)),
            scratch_shapes=[pltpu.VMEM((2 * L, tc), v_blc.dtype)],
        ),
        compiler_params=pltpu.CompilerParams(
            dimension_semantics=("parallel", "parallel"),
            vmem_limit_bytes=_VMEM_LIMIT,
        ),
    )(index.astype(jnp.int32), weights.astype(jnp.float32), v_blc)


# --------------------- inner correlation (AutoCorrelation) ------------------

def auto_correlation(queries, keys, values, factor=1):
    """Autoformer AutoCorrelation, training-mode time-delay aggregation.
    queries: [B, L, H, E], keys: [B, S, H, E], values: [B, S, H, D]."""
    B, L, H, E = queries.shape
    _, S, _, D = values.shape

    if L > S:
        values = jnp.concatenate(
            [values, jnp.zeros((B, L - S, H, D), values.dtype)], axis=1)
        keys = jnp.concatenate(
            [keys, jnp.zeros((B, L - S, H, E), keys.dtype)], axis=1)
    else:
        values = values[:, :L]
        keys = keys[:, :L]

    # TODO(synk): rfft/irfft have no Pallas TPU primitive; they stay in jnp.fft.  The
    # elementwise cross-spectrum q_fft * conj(k_fft) is intentionally left to XLA so it
    # fuses with the FFTs instead of forcing an extra HBM round trip.
    q_fft = jnp.fft.rfft(queries.astype(jnp.float32), axis=1)
    k_fft = jnp.fft.rfft(keys.astype(jnp.float32), axis=1)
    corr = jnp.fft.irfft(q_fft * jnp.conj(k_fft), n=L, axis=1)  # [B, L, H, E]

    # --- time_delay_agg_training (data-dependent top-k stays in plain JAX) ---
    top_k = max(1, int(factor * math.log(L)))
    mean_value = jnp.mean(corr, axis=(2, 3))                       # [B, L]
    _, index = jax.lax.top_k(jnp.mean(mean_value, axis=0), top_k)  # [k]
    weights = jnp.take(mean_value, index, axis=1)                  # [B, k]
    tmp_corr = jax.nn.softmax(weights, axis=-1)                    # [B, k]

    v_blc = values.reshape(B, L, H * D)                            # lane-dense channel axis
    agg = pallas_time_delay_agg(v_blc, index, tmp_corr)            # [B, L, H*D]
    return agg.reshape(B, L, H, D), None  # output_attention = False


# ---------------------------- the layer itself ------------------------------

class AutoCorrelationLayerPallas:
    def __init__(self, d_model, n_heads, d_keys=None, d_values=None, factor=1,
                 key=jax.random.PRNGKey(42)):
        d_keys = d_keys or d_model // n_heads
        d_values = d_values or d_model // n_heads
        self.n_heads = n_heads
        self.factor = factor

        ks = jax.random.split(key, 8)

        def init_linear(kw, kb, din, dout):
            bound = 1.0 / math.sqrt(din)
            w = jax.random.uniform(kw, (din, dout), jnp.float32, -bound, bound)
            b = jax.random.uniform(kb, (dout,), jnp.float32, -bound, bound)
            return w, b

        self.wq, self.bq = init_linear(ks[0], ks[1], d_model, d_keys * n_heads)
        self.wk, self.bk = init_linear(ks[2], ks[3], d_model, d_keys * n_heads)
        self.wv, self.bv = init_linear(ks[4], ks[5], d_model, d_values * n_heads)
        self.wo, self.bo = init_linear(ks[6], ks[7], d_values * n_heads, d_model)

        # Pre-fused QKV weights for the self-attention case (single pass over activation,
        # wider lane-dense output).
        self.w_qkv = jnp.concatenate([self.wq, self.wk, self.wv], axis=1)
        self.b_qkv = jnp.concatenate([self.bq, self.bk, self.bv])
        self._d_qk = d_keys * n_heads

    def __call__(self, queries, keys, values, attn_mask=None):
        B, L, _ = queries.shape
        _, S, _ = keys.shape
        H = self.n_heads

        if (queries is keys) and (keys is values):
            # self-attention: fused QKV projection — activation read from HBM once
            qkv = pallas_linear(queries.reshape(B * L, -1), self.w_qkv, self.b_qkv)
            dqk = self._d_qk
            q = qkv[:, :dqk].reshape(B, L, H, -1)
            k = qkv[:, dqk:2 * dqk].reshape(B, S, H, -1)
            v = qkv[:, 2 * dqk:].reshape(B, S, H, -1)
        else:
            q = pallas_linear(queries.reshape(B * L, -1), self.wq, self.bq).reshape(B, L, H, -1)
            k = pallas_linear(keys.reshape(B * S, -1), self.wk, self.bk).reshape(B, S, H, -1)
            v = pallas_linear(values.reshape(B * S, -1), self.wv, self.bv).reshape(B, S, H, -1)

        out, attn = auto_correlation(q, k, v, factor=self.factor)
        out = out.reshape(B, L, -1)
        out = pallas_linear(out.reshape(B * L, -1), self.wo, self.bo).reshape(B, L, -1)
        return out, attn


# ----------------------------- pure-JAX reference ---------------------------

def reference_forward(layer, queries, keys, values, factor=1):
    B, L, _ = queries.shape
    _, S, _ = keys.shape
    H = layer.n_heads
    q = (queries.reshape(B * L, -1) @ layer.wq + layer.bq).reshape(B, L, H, -1)
    k = (keys.reshape(B * S, -1) @ layer.wk + layer.bk).reshape(B, S, H, -1)
    v = (values.reshape(B * S, -1) @ layer.wv + layer.bv).reshape(B, S, H, -1)
    if L > S:
        v = jnp.concatenate([v, jnp.zeros((B, L - S) + v.shape[2:], v.dtype)], axis=1)
        k = jnp.concatenate([k, jnp.zeros((B, L - S) + k.shape[2:], k.dtype)], axis=1)
    else:
        v = v[:, :L]
        k = k[:, :L]
    q_t = jnp.transpose(q, (0, 2, 3, 1))
    k_t = jnp.transpose(k, (0, 2, 3, 1))
    v_t = jnp.transpose(v, (0, 2, 3, 1))
    corr = jnp.fft.irfft(jnp.fft.rfft(q_t, axis=-1) * jnp.conj(jnp.fft.rfft(k_t, axis=-1)),
                         n=L, axis=-1)
    top_k = max(1, int(factor * math.log(L)))
    mean_value = corr.mean(axis=1).mean(axis=1)
    _, index = jax.lax.top_k(mean_value.mean(axis=0), top_k)
    weights = jnp.take(mean_value, index, axis=1)
    tmp_corr = jax.nn.softmax(weights, axis=-1)
    delays = jnp.zeros_like(v_t)
    for i in range(top_k):  # NOTE: eager-only reference (int() on traced value under jit)
        pattern = jnp.roll(v_t, -int(index[i]), axis=-1)
        delays = delays + pattern * tmp_corr[:, i][:, None, None, None]
    out = jnp.transpose(delays, (0, 3, 1, 2)).reshape(B, L, -1)
    return ((out.reshape(B * L, -1) @ layer.wo) + layer.bo).reshape(B, L, -1)


# ----------------------------------- main ------------------------------------

if __name__ == "__main__":
    B, L, S, d_model, n_heads = 2, 16, 16, 32, 4

    key = jax.random.PRNGKey(0)
    kq, kk, kv = jax.random.split(key, 3)
    queries = jax.random.normal(kq, (B, L, d_model), jnp.float32)
    keys = jax.random.normal(kk, (B, S, d_model), jnp.float32)
    values = jax.random.normal(kv, (B, S, d_model), jnp.float32)

    layer = AutoCorrelationLayerPallas(d_model, n_heads)

    # cross-attention style inputs (distinct q / k / v): separate projections
    out, attn = layer(queries, keys, values, attn_mask=None)
    out = jax.block_until_ready(out)
    assert out.shape == (B, L, d_model)
    assert attn is None  # output_attention=False in the reference module
    ref = reference_forward(layer, queries, keys, values)
    assert jnp.allclose(out, ref, atol=1e-4, rtol=1e-4), "mismatch vs pure-JAX reference"

    # self-attention style inputs: exercises the fused-QKV projection path
    out_sa, _ = layer(queries, queries, queries, attn_mask=None)
    out_sa = jax.block_until_ready(out_sa)
    ref_sa = reference_forward(layer, queries, queries, queries)
    assert jnp.allclose(out_sa, ref_sa, atol=1e-4, rtol=1e-4), "mismatch (fused QKV path)"

    print("KERNEL_OK")
</pallas_src>

<mosaic_0001>
module attributes {stable_mosaic.version = 11 : i64} {
  func.func @_linear_kernel(%arg0: i32, %arg1: i32, %arg2: i32, %arg3: memref<32x32xf32, #tpu.memory_space<vmem>>, %arg4: memref<32x32xf32, #tpu.memory_space<vmem>>, %arg5: memref<1x32xf32, #tpu.memory_space<vmem>>, %arg6: memref<32x32xf32, #tpu.memory_space<vmem>>, %arg7: memref<32x32xf32, #tpu.memory_space<vmem>>) attributes {dimension_semantics = [#tpu.dimension_semantics<parallel>, #tpu.dimension_semantics<parallel>, #tpu.dimension_semantics<arbitrary>], iteration_bounds = array<i64: 1, 1, 1>, scalar_prefetch = 0 : i64, scratch_operands = 1 : i64, tpu.core_type = #tpu.core_type<tc>, window_params = [{transform_indices = @transform_0, window_bounds = array<i64: 32, 32>}, {transform_indices = @transform_1, window_bounds = array<i64: 32, 32>}, {transform_indices = @transform_2, window_bounds = array<i64: 1, 32>}, {transform_indices = @transform_3, window_bounds = array<i64: 32, 32>}]} {
    %c0_i32 = arith.constant 0 : i32
    %0 = arith.cmpi eq, %arg2, %c0_i32 : i32
    %1 = arith.extui %0 : i1 to i32
    %c0_i32_0 = arith.constant 0 : i32
    %2 = arith.cmpi ne, %1, %c0_i32_0 : i32
    scf.if %2 {
      %c0_10 = arith.constant 0 : index
      %c0_11 = arith.constant 0 : index
      %12 = vector.load %arg5[%c0_10, %c0_11] : memref<1x32xf32, #tpu.memory_space<vmem>>, vector<1x32xf32>
      %13 = vector.shape_cast %12 : vector<1x32xf32> to vector<1x32xf32>
      %14 = vector.broadcast %13 : vector<1x32xf32> to vector<32x32xf32>
      %c0_12 = arith.constant 0 : index
      %c0_13 = arith.constant 0 : index
      %15 = vector.load %arg7[%c0_12, %c0_13] : memref<32x32xf32, #tpu.memory_space<vmem>>, vector<32x32xf32>
      tpu.vector_store %arg7[%c0_12, %c0_13], %14 {strides = array<i32>} : memref<32x32xf32, #tpu.memory_space<vmem>>, vector<32x32xf32>,
    } else {
    }
    %c0 = arith.constant 0 : index
    %c0_1 = arith.constant 0 : index
    %3 = vector.load %arg7[%c0, %c0_1] : memref<32x32xf32, #tpu.memory_space<vmem>>, vector<32x32xf32>
    %c0_2 = arith.constant 0 : index
    %c0_3 = arith.constant 0 : index
    %4 = vector.load %arg3[%c0_2, %c0_3] : memref<32x32xf32, #tpu.memory_space<vmem>>, vector<32x32xf32>
    %c0_4 = arith.constant 0 : index
    %c0_5 = arith.constant 0 : index
    %5 = vector.load %arg4[%c0_4, %c0_5] : memref<32x32xf32, #tpu.memory_space<vmem>>, vector<32x32xf32>
    %cst = arith.constant dense<0.000000e+00> : vector<32x32xf32>
    %6 = tpu.matmul %4, %5, %cst {dimension_numbers = #tpu.dot_dimension_numbers<[1], [0], [0], [1], [0, 0, 1, 1], [], []>} : vector<32x32xf32>, vector<32x32xf32>, vector<32x32xf32> -> vector<32x32xf32>
    %7 = arith.addf %3, %6 : vector<32x32xf32>
    %c0_6 = arith.constant 0 : index
    %c0_7 = arith.constant 0 : index
    %8 = vector.load %arg7[%c0_6, %c0_7] : memref<32x32xf32, #tpu.memory_space<vmem>>, vector<32x32xf32>
    tpu.vector_store %arg7[%c0_6, %c0_7], %7 {strides = array<i32>} : memref<32x32xf32, #tpu.memory_space<vmem>>, vector<32x32xf32>,
    %c0_i32_8 = arith.constant 0 : i32
    %9 = arith.cmpi eq, %arg2, %c0_i32_8 : i32
    %10 = arith.extui %9 : i1 to i32
    %c0_i32_9 = arith.constant 0 : i32
    %11 = arith.cmpi ne, %10, %c0_i32_9 : i32
    scf.if %11 {
      %c0_10 = arith.constant 0 : index
      %c0_11 = arith.constant 0 : index
      %12 = vector.load %arg7[%c0_10, %c0_11] : memref<32x32xf32, #tpu.memory_space<vmem>>, vector<32x32xf32>
      %c0_12 = arith.constant 0 : index
      %c0_13 = arith.constant 0 : index
      %13 = vector.load %arg6[%c0_12, %c0_13] : memref<32x32xf32, #tpu.memory_space<vmem>>, vector<32x32xf32>
      tpu.vector_store %arg6[%c0_12, %c0_13], %12 {strides = array<i32>} : memref<32x32xf32, #tpu.memory_space<vmem>>, vector<32x32xf32>,
    } else {
    }
    return
  }
  func.func @transform_0(%arg0: i32, %arg1: i32, %arg2: i32) -> (i32, i32) {
    %c0_i32 = arith.constant 0 : i32
    return %arg0, %arg2 : i32, i32
  }
  func.func @transform_1(%arg0: i32, %arg1: i32, %arg2: i32) -> (i32, i32) {
    %c0_i32 = arith.constant 0 : i32
    return %arg2, %arg1 : i32, i32
  }
  func.func @transform_2(%arg0: i32, %arg1: i32, %arg2: i32) -> (i32, i32) {
    %c0_i32 = arith.constant 0 : i32
    %c0_i32_0 = arith.constant 0 : i32
    return %c0_i32, %arg1 : i32, i32
  }
  func.func @transform_3(%arg0: i32, %arg1: i32, %arg2: i32) -> (i32, i32) {
    %c0_i32 = arith.constant 0 : i32
    return %arg0, %arg1 : i32, i32
  }
}

</mosaic_0001>

<bundles_post_ra>
// kernel: tpu_custom_call.1
= control target key start
LH: loop header
LB: loop body
LE: loop exit
PB: predicated region body
PF: predicated region fallthrough
CT: control target
= control target key end

     0   :  { %8 = vsyncpa [#allocation4], 0  ;;  %s315_s0 = inlined_call_operand.hbm [shape: f32[32,32], index: 0, kind: input, shape index: {}]   ;;  %s316_s1 = inlined_call_operand.hbm [shape: f32[32,32], index: 1, kind: input, shape index: {}]   ;;  %s317_s2 = inlined_call_operand.vmem [shape: f32[1,32], index: 2, kind: input, shape index: {}]   ;;  %s318_s3 = inlined_call_operand.hbm [shape: f32[32,32], index: 3, kind: output, shape index: {}]  }
   0x1   :  { %9 = vsyncpa [#allocation7], 0 }
   0x2   :  { %10 = vsyncpa [#allocation5], 0  ;;  %s15_s14 = sshll.u32 %s315_s0, 4  ;;  %s253_s15 = smov [#allocation3]   ;;  %s16_s14 = int_to_ptr.hbm [resolvable:$true] %s15_s14 }
   0x3   :  { %s17_s16 = sshll.u32 %s253_s15, 4  ;;  %s28_s19 = sshll.u32 %s316_s1, 4  ;;  %s18_s16 = int_to_ptr.vmem [resolvable:$true] %s17_s16  ;;  %s29_s19 = int_to_ptr.hbm [resolvable:$true] %s28_s19 }
   0x4   :  { %s254_s20 = smov 128   ;;  %s255_s21 = smov 8  }
   0x5   :  { %23 = dma.hbm_to_vmem [thread:$0]  %s16_s14, 512, %s18_s16, [#allocation4], %s254_s20, %s254_s20, %s255_s21  }
   0x6   :  { %s256_s22 = smov [#allocation6]  }
   0x7   :  { %s30_s23 = sshll.u32 %s256_s22, 4  ;;  %s31_s23 = int_to_ptr.vmem [resolvable:$true] %s30_s23 }
   0x8   :  { %36 = dma.hbm_to_vmem [thread:$0]  %s29_s19, 512, %s31_s23, [#allocation7], %s254_s20, %s254_s20, %s255_s21  }
   0x9   :  { %247 = dma.done.wait [#allocation4], 512  }
   0xa   :  { %248 = vsyncadd [#allocation4], 4294966784 }
   0xb   :  { %249 = dma.done.wait [#allocation7], 512  }
   0xc   :  { %250 = vsyncadd [#allocation7], 4294966784  ;;  %v71_v0 = vld [vmem:[#allocation6 + $0x18] sm:$0xff]  ;;  %v70_v1 = vld [vmem:[#allocation6 + $0x10] sm:$0xff]  ;;  %vm55_vm0 = vcmask 261120   ;;  %s139_s27 = sshll.u32 %s318_s3, 4  ;;  %s140_s27 = int_to_ptr.hbm [resolvable:$true] %s139_s27 }
   0xd   :  { %158 = vmatpush.msra.mxu2 %v71_v0  ;;  %159 = vmatpush.msra.mxu3 %v71_v0  ;;  %v69_v2 = vld [vmem:[#allocation6 + $0x8] sm:$0xff]  ;;  %v174_v3 = vld [vmem:[%s317_s2] ss:$0 sm:$0xff]  ;;  %v66_v5 = vld [vmem:[#allocation3 + $0x10] sm:$0xff]  ;;  %s257_s2 = smov [#allocation8]  }
   0xe   :  { %97 = vmatpush.msra.mxu0 %v71_v0  ;;  %157 = vmatpush.msra.mxu1 %v71_v0  ;;  %v68_v4 = vld [vmem:[#allocation6] sm:$0xff]  ;;  %v67_v6 = vld [vmem:[#allocation3 + $0x18] sm:$0xff]  ;;  %56 = vst.msk [vmem:[#allocation2] sm:$0xff] %vm55_vm0, %v174_v3  ;;  %v65_v8 = vld [vmem:[#allocation3 + $0x8] sm:$0xff]  ;;  %s137_s24 = sshll.u32 %s257_s2, 4  ;;  %s138_s24 = int_to_ptr.vmem [resolvable:$true] %s137_s24 }
   0xf   :  { %161 = vmatpush.msra.mxu2 %v70_v1  ;;  %162 = vmatpush.msra.mxu3 %v70_v1  ;;  %57 = vst.msk [vmem:[#allocation2 + $0x8] sm:$0xff] %vm55_vm0, %v174_v3  ;;  %v64_v7 = vld [vmem:[#allocation3] sm:$0xff] }
  0x10   :  { %98 = vmatpush.msra.mxu0 %v70_v1  ;;  %160 = vmatpush.msra.mxu1 %v70_v1  ;;  %58 = vst.msk [vmem:[#allocation2 + $0x10] sm:$0xff] %vm55_vm0, %v174_v3 }
  0x11   :  { %164 = vmatpush.msra.mxu2 %v69_v2  ;;  %165 = vmatpush.msra.mxu3 %v69_v2  ;;  %59 = vst.msk [vmem:[#allocation2 + $0x18] sm:$0xff] %vm55_vm0, %v174_v3 }
  0x12   :  { %99 = vmatpush.msra.mxu0 %v69_v2  ;;  %163 = vmatpush.msra.mxu1 %v69_v2 }
  0x13   :  { %167 = vmatpush.msra.mxu2 %v68_v4  ;;  %168 = vmatpush.msra.mxu3 %v68_v4 }
  0x14   :  { %155 = vmatmul.msk.f32.vlgmr.msra.gmra.mxu2 %vm55_vm0, %v66_v5  ;;  %156 = vmatmul.msk.f32.vlgmr.msra.gmra.mxu3 %vm55_vm0, %v67_v6 }
  0x15   :  { %100 = vmatpush.msra.mxu0 %v68_v4  ;;  %166 = vmatpush.msra.mxu1 %v68_v4  ;;  %v60_v9 = vld [vmem:[#allocation2] sm:$0xff] }
  0x16   :  { %153 = vmatmul.msk.f32.vlgmr.msra.gmra.mxu0 %vm55_vm0, %v64_v7  ;;  %154 = vmatmul.msk.f32.vlgmr.msra.gmra.mxu1 %vm55_vm0, %v65_v8  ;;  %v61_v10 = vld [vmem:[#allocation2 + $0x8] sm:$0xff] }
  0x17   :  { %v62_v15 = vld [vmem:[#allocation2 + $0x10] sm:$0xff] }
  0x18   :  { %v63_v16 = vld [vmem:[#allocation2 + $0x18] sm:$0xff] }
  0x93   :  { %v102_v11 = vpop.f32.mrf.mxu0  ;;  %v105_v12 = vpop.f32.mrf.mxu1 }
  0x94   :  { %v114_v13 = vadd.f32 %v102_v11, %v60_v9  ;;  %v115_v14 = vadd.f32 %v105_v12, %v61_v10 }
  0x96   :  { %118 = vst.msk [vmem:[#allocation2] sm:$0xff] %vm55_vm0, %v114_v13 }
  0x97   :  { %119 = vst.msk [vmem:[#allocation2 + $0x8] sm:$0xff] %vm55_vm0, %v115_v14  ;;  %v108_v17 = vpop.f32.mrf.mxu2  ;;  %v111_v18 = vpop.f32.mrf.mxu3 }
  0x98   :  { %v116_v19 = vadd.f32 %v108_v17, %v62_v15  ;;  %v117_v20 = vadd.f32 %v111_v18, %v63_v16 }
  0x9a   :  { %120 = vst.msk [vmem:[#allocation2 + $0x10] sm:$0xff] %vm55_vm0, %v116_v19 }
  0x9b   :  { %121 = vst.msk [vmem:[#allocation2 + $0x18] sm:$0xff] %vm55_vm0, %v117_v20 }
  0x9d   :  { %v125_v21 = vld [vmem:[#allocation2] sm:$0xff] }
  0x9e   :  { %v126_v22 = vld [vmem:[#allocation2 + $0x8] sm:$0xff]  ;;  %129 = vst.msk [vmem:[#allocation8] sm:$0xff] %vm55_vm0, %v125_v21 }
  0x9f   :  { %130 = vst.msk [vmem:[#allocation8 + $0x8] sm:$0xff] %vm55_vm0, %v126_v22 }
  0xa1   :  { %v127_v23 = vld [vmem:[#allocation2 + $0x10] sm:$0xff] }
  0xa2   :  { %v128_v24 = vld [vmem:[#allocation2 + $0x18] sm:$0xff]  ;;  %131 = vst.msk [vmem:[#allocation8 + $0x10] sm:$0xff] %vm55_vm0, %v127_v23 }
  0xa3   :  { %132 = vst.msk [vmem:[#allocation8 + $0x18] sm:$0xff] %vm55_vm0, %v128_v24 }
  0xa4   :  { %145 = dma.vmem_to_hbm [thread:$0]  %s138_s24, 512, %s140_s27, [#allocation5], %s254_s20, %s254_s20, %s255_s21  }
  0xa5   :  { %251 = dma.done.wait [#allocation5], 512  }
  0xa6   :  { %252 = vsyncadd [#allocation5], 4294966784 }
  0xa7   :  { %150 = vsyncpa [#allocation4], 1 }
  0xa8   :  { %151 = vsyncpa [#allocation7], 1 }
  0xa9   :  { %152 = vsyncpa [#allocation5], 1 }

</bundles_post_ra>
